<compile_context>
chip_gen: v7x
topology: tpu7x:2x2x1
jax: 0.10.0
libtpu: 0.0.40
codegen_flags: <defaults>
</compile_context>

<pallas_src>
import functools

import jax
import jax.numpy as jnp
from jax import lax
from jax.experimental import pallas as pl
from jax.experimental.pallas import tpu as pltpu


def _layernorm(z, gamma, beta, eps):
    mu = jnp.mean(z, axis=-1, keepdims=True)
    var = jnp.mean((z - mu) ** 2, axis=-1, keepdims=True)
    return (z - mu) * lax.rsqrt(var + eps) * gamma + beta


# ---------------------------------------------------------------------------
# Fused kernel: MHA (all heads) + output proj + LN + FFN + LN, per batch item.
# ---------------------------------------------------------------------------
def _encoder_layer_kernel(x_ref, wq_ref, wk_ref, wv_ref,
                          wo_ref, bo_ref, g1_ref, b1_ref,
                          w1_ref, bb1_ref, w2_ref, bb2_ref,
                          g2_ref, b2_ref,
                          out_ref, attn_ref, *, n_head, d_k, d_v, eps):
    x = x_ref[0]                                  # (L, D) f32 (kept f32 for residual)
    x_bf = x.astype(jnp.bfloat16)

    # Fused per-head projections: one lane-dense bf16 matmul each, f32 accum.
    # 1/sqrt(d_model) is pre-folded into wq_ref by the wrapper.
    q_all = jnp.dot(x_bf, wq_ref[...], preferred_element_type=jnp.float32)  # (L, H*dk)
    k_all = jnp.dot(x_bf, wk_ref[...], preferred_element_type=jnp.float32)  # (L, H*dk)
    v_all = jnp.dot(x_bf, wv_ref[...], preferred_element_type=jnp.float32)  # (L, H*dv)
    q_bf = q_all.astype(jnp.bfloat16)
    k_bf = k_all.astype(jnp.bfloat16)
    v_bf = v_all.astype(jnp.bfloat16)

    ctx_heads = []
    for h in range(n_head):                       # static unrolled loop (H is small)
        qh = q_bf[:, h * d_k:(h + 1) * d_k]
        kh = k_bf[:, h * d_k:(h + 1) * d_k]
        vh = v_bf[:, h * d_v:(h + 1) * d_v]

        # q @ k^T without materializing a transpose: contract last dims of both.
        s = lax.dot_general(qh, kh, (((1,), (1,)), ((), ())),
                            preferred_element_type=jnp.float32)             # (L, L) f32
        s = s - jnp.max(s, axis=-1, keepdims=True)
        p = jnp.exp(s)
        p = p * pl.reciprocal(jnp.sum(p, axis=-1, keepdims=True), approx=True)

        attn_ref[h, 0] = p
        ctx_heads.append(jnp.dot(p.astype(jnp.bfloat16), vh,
                                 preferred_element_type=jnp.float32))        # (L, dv)

    # Head-major concat == torch.cat(torch.split(outputs, B, 0), -1); stays in VMEM.
    ctx = jnp.concatenate(ctx_heads, axis=-1)     # (L, H*dv)

    # Output projection (+ dropout: identity in eval) + residual + LN.
    proj = jnp.dot(ctx.astype(jnp.bfloat16), wo_ref[...],
                   preferred_element_type=jnp.float32) + bo_ref[...]
    z = _layernorm(proj + x, g1_ref[...], b1_ref[...], eps)                  # (L, D)

    # Position-wise FFN (Conv1d kernel=1 == per-position linear) + residual + LN.
    hdn = jnp.maximum(
        jnp.dot(z.astype(jnp.bfloat16), w1_ref[...],
                preferred_element_type=jnp.float32) + bb1_ref[...], 0.0)
    y = jnp.dot(hdn.astype(jnp.bfloat16), w2_ref[...],
                preferred_element_type=jnp.float32) + bb2_ref[...]
    out_ref[0] = _layernorm(y + z, g2_ref[...], b2_ref[...], eps)


# ---------------------------------------------------------------------------
# Wrapper
# ---------------------------------------------------------------------------
def encoder_layer(x, params):
    B, L, D = x.shape
    H, _, dk = params["w_qs"].shape
    dv = params["w_vs"].shape[-1]
    d_inner = params["ffn_w1"].shape[-1]
    temper = float(D) ** 0.5   # reference repo scales by sqrt(d_model)

    # Fuse heads into lane-dense weight matrices; fold 1/temper into W_q;
    # cast matmul weights to bf16 (halves weight DMA, hits MXU bf16 peak).
    wq = (jnp.transpose(params["w_qs"], (1, 0, 2)).reshape(D, H * dk)
          / temper).astype(jnp.bfloat16)
    wk = jnp.transpose(params["w_ks"], (1, 0, 2)).reshape(D, H * dk).astype(jnp.bfloat16)
    wv = jnp.transpose(params["w_vs"], (1, 0, 2)).reshape(D, H * dv).astype(jnp.bfloat16)
    wo = params["w_proj"].astype(jnp.bfloat16)
    w1 = params["ffn_w1"].astype(jnp.bfloat16)
    w2 = params["ffn_w2"].astype(jnp.bfloat16)

    kernel = functools.partial(_encoder_layer_kernel,
                               n_head=H, d_k=dk, d_v=dv, eps=1e-6)

    # Weight blocks are grid-invariant (index_map returns (0,0) for every b),
    # so Pallas does not re-fetch them across grid steps.
    out, attn = pl.pallas_call(
        kernel,
        grid=(B,),
        in_specs=[
            pl.BlockSpec((1, L, D), lambda b: (b, 0, 0)),        # x
            pl.BlockSpec((D, H * dk), lambda b: (0, 0)),         # wq (scaled)
            pl.BlockSpec((D, H * dk), lambda b: (0, 0)),         # wk
            pl.BlockSpec((D, H * dv), lambda b: (0, 0)),         # wv
            pl.BlockSpec((H * dv, D), lambda b: (0, 0)),         # w_proj
            pl.BlockSpec((1, D), lambda b: (0, 0)),              # b_proj
            pl.BlockSpec((1, D), lambda b: (0, 0)),              # ln1_g
            pl.BlockSpec((1, D), lambda b: (0, 0)),              # ln1_b
            pl.BlockSpec((D, d_inner), lambda b: (0, 0)),        # ffn_w1
            pl.BlockSpec((1, d_inner), lambda b: (0, 0)),        # ffn_b1
            pl.BlockSpec((d_inner, D), lambda b: (0, 0)),        # ffn_w2
            pl.BlockSpec((1, D), lambda b: (0, 0)),              # ffn_b2
            pl.BlockSpec((1, D), lambda b: (0, 0)),              # ln2_g
            pl.BlockSpec((1, D), lambda b: (0, 0)),              # ln2_b
        ],
        out_specs=[
            pl.BlockSpec((1, L, D), lambda b: (b, 0, 0)),        # enc_output
            pl.BlockSpec((H, 1, L, L), lambda b: (0, b, 0, 0)),  # attn, head-major
        ],
        out_shape=[
            jax.ShapeDtypeStruct((B, L, D), jnp.float32),
            jax.ShapeDtypeStruct((H, B, L, L), jnp.float32),
        ],
        compiler_params=pltpu.CompilerParams(
            dimension_semantics=("parallel",)),
    )(x, wq, wk, wv, wo,
      params["b_proj"], params["ln1_g"], params["ln1_b"],
      w1, params["ffn_b1"], w2, params["ffn_b2"],
      params["ln2_g"], params["ln2_b"])

    # PyTorch returns attn with shape (n_head*B, L, L), head-major ordering.
    # (H,B,L,L) -> (H*B,L,L) is a contiguous (free) reshape.
    return out, attn.reshape(H * B, L, L)


def init_params(key, d_model, d_inner, n_head, d_k, d_v):
    ks = jax.random.split(key, 8)

    def xn(k, shape, fan_in, fan_out):
        scale = (2.0 / (fan_in + fan_out)) ** 0.5
        return scale * jax.random.normal(k, shape, dtype=jnp.float32)

    return {
        "w_qs": xn(ks[0], (n_head, d_model, d_k), d_model, d_k),
        "w_ks": xn(ks[1], (n_head, d_model, d_k), d_model, d_k),
        "w_vs": xn(ks[2], (n_head, d_model, d_v), d_model, d_v),
        "w_proj": xn(ks[3], (n_head * d_v, d_model), n_head * d_v, d_model),
        "b_proj": jnp.zeros((1, d_model), jnp.float32),
        "ln1_g": jnp.ones((1, d_model), jnp.float32),
        "ln1_b": jnp.zeros((1, d_model), jnp.float32),
        "ffn_w1": xn(ks[4], (d_model, d_inner), d_model, d_inner),
        "ffn_b1": jnp.zeros((1, d_inner), jnp.float32),
        "ffn_w2": xn(ks[5], (d_inner, d_model), d_inner, d_model),
        "ffn_b2": jnp.zeros((1, d_model), jnp.float32),
        "ln2_g": jnp.ones((1, d_model), jnp.float32),
        "ln2_b": jnp.zeros((1, d_model), jnp.float32),
    }


if __name__ == "__main__":
    B, L = 2, 8
    d_model, d_inner, n_head, d_k, d_v = 32, 64, 2, 16, 16

    key = jax.random.PRNGKey(0)
    k_x, k_p = jax.random.split(key)
    x = jax.random.normal(k_x, (B, L, d_model), dtype=jnp.float32)
    params = init_params(k_p, d_model, d_inner, n_head, d_k, d_v)

    enc_out, enc_attn = encoder_layer(x, params)
    jax.block_until_ready((enc_out, enc_attn))

    assert enc_out.shape == (B, L, d_model)
    assert enc_attn.shape == (n_head * B, L, L)
    print("KERNEL_OK")
</pallas_src>

<mosaic_0001>
module attributes {stable_mosaic.version = 11 : i64} {
  func.func @_encoder_layer_kernel(%arg0: i32, %arg1: memref<1x8x32xf32, #tpu.memory_space<vmem>>, %arg2: memref<32x32xbf16, #tpu.memory_space<vmem>>, %arg3: memref<32x32xbf16, #tpu.memory_space<vmem>>, %arg4: memref<32x32xbf16, #tpu.memory_space<vmem>>, %arg5: memref<32x32xbf16, #tpu.memory_space<vmem>>, %arg6: memref<1x32xf32, #tpu.memory_space<vmem>>, %arg7: memref<1x32xf32, #tpu.memory_space<vmem>>, %arg8: memref<1x32xf32, #tpu.memory_space<vmem>>, %arg9: memref<32x64xbf16, #tpu.memory_space<vmem>>, %arg10: memref<1x64xf32, #tpu.memory_space<vmem>>, %arg11: memref<64x32xbf16, #tpu.memory_space<vmem>>, %arg12: memref<1x32xf32, #tpu.memory_space<vmem>>, %arg13: memref<1x32xf32, #tpu.memory_space<vmem>>, %arg14: memref<1x32xf32, #tpu.memory_space<vmem>>, %arg15: memref<1x8x32xf32, #tpu.memory_space<vmem>>, %arg16: memref<2x1x8x8xf32, #tpu.memory_space<vmem>>) attributes {dimension_semantics = [#tpu.dimension_semantics<parallel>], iteration_bounds = array<i64: 2>, scalar_prefetch = 0 : i64, scratch_operands = 0 : i64, tpu.core_type = #tpu.core_type<tc>, window_params = [{transform_indices = @transform_0, window_bounds = array<i64: 1, 8, 32>}, {pipeline_mode = #tpu.pipeline_mode<synchronous>, transform_indices = @transform_1, window_bounds = array<i64: 32, 32>}, {pipeline_mode = #tpu.pipeline_mode<synchronous>, transform_indices = @transform_2, window_bounds = array<i64: 32, 32>}, {pipeline_mode = #tpu.pipeline_mode<synchronous>, transform_indices = @transform_3, window_bounds = array<i64: 32, 32>}, {pipeline_mode = #tpu.pipeline_mode<synchronous>, transform_indices = @transform_4, window_bounds = array<i64: 32, 32>}, {pipeline_mode = #tpu.pipeline_mode<synchronous>, transform_indices = @transform_5, window_bounds = array<i64: 1, 32>}, {pipeline_mode = #tpu.pipeline_mode<synchronous>, transform_indices = @transform_6, window_bounds = array<i64: 1, 32>}, {pipeline_mode = #tpu.pipeline_mode<synchronous>, transform_indices = @transform_7, window_bounds = array<i64: 1, 32>}, {pipeline_mode = #tpu.pipeline_mode<synchronous>, transform_indices = @transform_8, window_bounds = array<i64: 32, 64>}, {pipeline_mode = #tpu.pipeline_mode<synchronous>, transform_indices = @transform_9, window_bounds = array<i64: 1, 64>}, {pipeline_mode = #tpu.pipeline_mode<synchronous>, transform_indices = @transform_10, window_bounds = array<i64: 64, 32>}, {pipeline_mode = #tpu.pipeline_mode<synchronous>, transform_indices = @transform_11, window_bounds = array<i64: 1, 32>}, {pipeline_mode = #tpu.pipeline_mode<synchronous>, transform_indices = @transform_12, window_bounds = array<i64: 1, 32>}, {pipeline_mode = #tpu.pipeline_mode<synchronous>, transform_indices = @transform_13, window_bounds = array<i64: 1, 32>}, {transform_indices = @transform_14, window_bounds = array<i64: 1, 8, 32>}, {transform_indices = @transform_15, window_bounds = array<i64: 2, 1, 8, 8>}]} {
    %c0 = arith.constant 0 : index
    %c0_0 = arith.constant 0 : index
    %c0_1 = arith.constant 0 : index
    %0 = vector.load %arg1[%c0, %c0_0, %c0_1] : memref<1x8x32xf32, #tpu.memory_space<vmem>>, vector<1x8x32xf32>
    %1 = vector.shape_cast %0 : vector<1x8x32xf32> to vector<8x32xf32>
    %2 = arith.truncf %1 : vector<8x32xf32> to vector<8x32xbf16>
    %c0_2 = arith.constant 0 : index
    %c0_3 = arith.constant 0 : index
    %3 = vector.load %arg2[%c0_2, %c0_3] : memref<32x32xbf16, #tpu.memory_space<vmem>>, vector<32x32xbf16>
    %cst = arith.constant dense<0.000000e+00> : vector<8x32xf32>
    %4 = tpu.matmul %2, %3, %cst {dimension_numbers = #tpu.dot_dimension_numbers<[1], [0], [0], [1], [0, 0, 1, 1], [], []>} : vector<8x32xbf16>, vector<32x32xbf16>, vector<8x32xf32> -> vector<8x32xf32>
    %c0_4 = arith.constant 0 : index
    %c0_5 = arith.constant 0 : index
    %5 = vector.load %arg3[%c0_4, %c0_5] : memref<32x32xbf16, #tpu.memory_space<vmem>>, vector<32x32xbf16>
    %cst_6 = arith.constant dense<0.000000e+00> : vector<8x32xf32>
    %6 = tpu.matmul %2, %5, %cst_6 {dimension_numbers = #tpu.dot_dimension_numbers<[1], [0], [0], [1], [0, 0, 1, 1], [], []>} : vector<8x32xbf16>, vector<32x32xbf16>, vector<8x32xf32> -> vector<8x32xf32>
    %c0_7 = arith.constant 0 : index
    %c0_8 = arith.constant 0 : index
    %7 = vector.load %arg4[%c0_7, %c0_8] : memref<32x32xbf16, #tpu.memory_space<vmem>>, vector<32x32xbf16>
    %cst_9 = arith.constant dense<0.000000e+00> : vector<8x32xf32>
    %8 = tpu.matmul %2, %7, %cst_9 {dimension_numbers = #tpu.dot_dimension_numbers<[1], [0], [0], [1], [0, 0, 1, 1], [], []>} : vector<8x32xbf16>, vector<32x32xbf16>, vector<8x32xf32> -> vector<8x32xf32>
    %9 = arith.truncf %4 : vector<8x32xf32> to vector<8x32xbf16>
    %10 = arith.truncf %6 : vector<8x32xf32> to vector<8x32xbf16>
    %11 = arith.truncf %8 : vector<8x32xf32> to vector<8x32xbf16>
    %12 = vector.extract_strided_slice %9 {offsets = [0, 0], sizes = [8, 16], strides = [1, 1]} : vector<8x32xbf16> to vector<8x16xbf16>
    %13 = vector.extract_strided_slice %10 {offsets = [0, 0], sizes = [8, 16], strides = [1, 1]} : vector<8x32xbf16> to vector<8x16xbf16>
    %14 = vector.extract_strided_slice %11 {offsets = [0, 0], sizes = [8, 16], strides = [1, 1]} : vector<8x32xbf16> to vector<8x16xbf16>
    %cst_10 = arith.constant dense<0.000000e+00> : vector<8x8xf32>
    %15 = tpu.matmul %12, %13, %cst_10 {dimension_numbers = #tpu.dot_dimension_numbers<[1], [1], [0], [0], [0, 0, 1, 0], [], []>} : vector<8x16xbf16>, vector<8x16xbf16>, vector<8x8xf32> -> vector<8x8xf32>
    %cst_11 = arith.constant dense<0xFF800000> : vector<8xf32>
    %16 = vector.multi_reduction <maximumf>, %15, %cst_11 [1] : vector<8x8xf32> to vector<8xf32>
    %17 = vector.shape_cast %16 : vector<8xf32> to vector<8x1xf32>
    %18 = vector.broadcast %17 : vector<8x1xf32> to vector<8x8xf32>
    %19 = arith.subf %15, %18 : vector<8x8xf32>
    %20 = math.exp %19 : vector<8x8xf32>
    %cst_12 = arith.constant dense<0.000000e+00> : vector<8xf32>
    %21 = vector.multi_reduction <add>, %20, %cst_12 [1] : vector<8x8xf32> to vector<8xf32>
    %22 = vector.shape_cast %21 : vector<8xf32> to vector<8x1xf32>
    %23 = tpu.reciprocal %22 {approx = true} : vector<8x1xf32> -> vector<8x1xf32>
    %24 = vector.broadcast %23 : vector<8x1xf32> to vector<8x8xf32>
    %25 = arith.mulf %20, %24 : vector<8x8xf32>
    %c0_13 = arith.constant 0 : index
    %c0_14 = arith.constant 0 : index
    %c0_15 = arith.constant 0 : index
    %c0_16 = arith.constant 0 : index
    %26 = vector.load %arg16[%c0_13, %c0_14, %c0_15, %c0_16] : memref<2x1x8x8xf32, #tpu.memory_space<vmem>>, vector<1x1x8x8xf32>
    %27 = vector.shape_cast %26 : vector<1x1x8x8xf32> to vector<8x8xf32>
    %28 = vector.shape_cast %25 : vector<8x8xf32> to vector<1x1x8x8xf32>
    tpu.vector_store %arg16[%c0_13, %c0_14, %c0_15, %c0_16], %28 {strides = array<i32>} : memref<2x1x8x8xf32, #tpu.memory_space<vmem>>, vector<1x1x8x8xf32>,
    %29 = arith.truncf %25 : vector<8x8xf32> to vector<8x8xbf16>
    %cst_17 = arith.constant dense<0.000000e+00> : vector<8x16xf32>
    %30 = tpu.matmul %29, %14, %cst_17 {dimension_numbers = #tpu.dot_dimension_numbers<[1], [0], [0], [1], [0, 0, 1, 1], [], []>} : vector<8x8xbf16>, vector<8x16xbf16>, vector<8x16xf32> -> vector<8x16xf32>
    %31 = vector.extract_strided_slice %9 {offsets = [0, 16], sizes = [8, 16], strides = [1, 1]} : vector<8x32xbf16> to vector<8x16xbf16>
    %32 = vector.extract_strided_slice %10 {offsets = [0, 16], sizes = [8, 16], strides = [1, 1]} : vector<8x32xbf16> to vector<8x16xbf16>
    %33 = vector.extract_strided_slice %11 {offsets = [0, 16], sizes = [8, 16], strides = [1, 1]} : vector<8x32xbf16> to vector<8x16xbf16>
    %cst_18 = arith.constant dense<0.000000e+00> : vector<8x8xf32>
    %34 = tpu.matmul %31, %32, %cst_18 {dimension_numbers = #tpu.dot_dimension_numbers<[1], [1], [0], [0], [0, 0, 1, 0], [], []>} : vector<8x16xbf16>, vector<8x16xbf16>, vector<8x8xf32> -> vector<8x8xf32>
    %cst_19 = arith.constant dense<0xFF800000> : vector<8xf32>
    %35 = vector.multi_reduction <maximumf>, %34, %cst_19 [1] : vector<8x8xf32> to vector<8xf32>
    %36 = vector.shape_cast %35 : vector<8xf32> to vector<8x1xf32>
    %37 = vector.broadcast %36 : vector<8x1xf32> to vector<8x8xf32>
    %38 = arith.subf %34, %37 : vector<8x8xf32>
    %39 = math.exp %38 : vector<8x8xf32>
    %cst_20 = arith.constant dense<0.000000e+00> : vector<8xf32>
    %40 = vector.multi_reduction <add>, %39, %cst_20 [1] : vector<8x8xf32> to vector<8xf32>
    %41 = vector.shape_cast %40 : vector<8xf32> to vector<8x1xf32>
    %42 = tpu.reciprocal %41 {approx = true} : vector<8x1xf32> -> vector<8x1xf32>
    %43 = vector.broadcast %42 : vector<8x1xf32> to vector<8x8xf32>
    %44 = arith.mulf %39, %43 : vector<8x8xf32>
    %c1 = arith.constant 1 : index
    %c0_21 = arith.constant 0 : index
    %c0_22 = arith.constant 0 : index
    %c0_23 = arith.constant 0 : index
    %45 = vector.load %arg16[%c1, %c0_21, %c0_22, %c0_23] : memref<2x1x8x8xf32, #tpu.memory_space<vmem>>, vector<1x1x8x8xf32>
    %46 = vector.shape_cast %45 : vector<1x1x8x8xf32> to vector<8x8xf32>
    %47 = vector.shape_cast %44 : vector<8x8xf32> to vector<1x1x8x8xf32>
    tpu.vector_store %arg16[%c1, %c0_21, %c0_22, %c0_23], %47 {strides = array<i32>} : memref<2x1x8x8xf32, #tpu.memory_space<vmem>>, vector<1x1x8x8xf32>,
    %48 = arith.truncf %44 : vector<8x8xf32> to vector<8x8xbf16>
    %cst_24 = arith.constant dense<0.000000e+00> : vector<8x16xf32>
    %49 = tpu.matmul %48, %33, %cst_24 {dimension_numbers = #tpu.dot_dimension_numbers<[1], [0], [0], [1], [0, 0, 1, 1], [], []>} : vector<8x8xbf16>, vector<8x16xbf16>, vector<8x16xf32> -> vector<8x16xf32>
    %50 = tpu.concatenate %30, %49 in 1 : vector<8x16xf32>, vector<8x16xf32> -> vector<8x32xf32>
    %51 = arith.truncf %50 : vector<8x32xf32> to vector<8x32xbf16>
    %c0_25 = arith.constant 0 : index
    %c0_26 = arith.constant 0 : index
    %52 = vector.load %arg5[%c0_25, %c0_26] : memref<32x32xbf16, #tpu.memory_space<vmem>>, vector<32x32xbf16>
    %cst_27 = arith.constant dense<0.000000e+00> : vector<8x32xf32>
    %53 = tpu.matmul %51, %52, %cst_27 {dimension_numbers = #tpu.dot_dimension_numbers<[1], [0], [0], [1], [0, 0, 1, 1], [], []>} : vector<8x32xbf16>, vector<32x32xbf16>, vector<8x32xf32> -> vector<8x32xf32>
    %c0_28 = arith.constant 0 : index
    %c0_29 = arith.constant 0 : index
    %54 = vector.load %arg6[%c0_28, %c0_29] : memref<1x32xf32, #tpu.memory_space<vmem>>, vector<1x32xf32>
    %55 = vector.broadcast %54 : vector<1x32xf32> to vector<8x32xf32>
    %56 = arith.addf %53, %55 : vector<8x32xf32>
    %57 = arith.addf %56, %1 : vector<8x32xf32>
    %c0_30 = arith.constant 0 : index
    %c0_31 = arith.constant 0 : index
    %58 = vector.load %arg7[%c0_30, %c0_31] : memref<1x32xf32, #tpu.memory_space<vmem>>, vector<1x32xf32>
    %c0_32 = arith.constant 0 : index
    %c0_33 = arith.constant 0 : index
    %59 = vector.load %arg8[%c0_32, %c0_33] : memref<1x32xf32, #tpu.memory_space<vmem>>, vector<1x32xf32>
    %cst_34 = arith.constant dense<0.000000e+00> : vector<8xf32>
    %60 = vector.multi_reduction <add>, %57, %cst_34 [1] : vector<8x32xf32> to vector<8xf32>
    %61 = vector.shape_cast %60 : vector<8xf32> to vector<8x1xf32>
    %cst_35 = arith.constant 3.200000e+01 : f32
    %62 = vector.broadcast %cst_35 : f32 to vector<8x1xf32>
    %63 = arith.divf %61, %62 : vector<8x1xf32>
    %64 = vector.broadcast %63 : vector<8x1xf32> to vector<8x32xf32>
    %65 = arith.subf %57, %64 : vector<8x32xf32>
    %66 = arith.mulf %65, %65 : vector<8x32xf32>
    %cst_36 = arith.constant dense<0.000000e+00> : vector<8xf32>
    %67 = vector.multi_reduction <add>, %66, %cst_36 [1] : vector<8x32xf32> to vector<8xf32>
    %68 = vector.shape_cast %67 : vector<8xf32> to vector<8x1xf32>
    %cst_37 = arith.constant 3.200000e+01 : f32
    %69 = vector.broadcast %cst_37 : f32 to vector<8x1xf32>
    %70 = arith.divf %68, %69 : vector<8x1xf32>
    %71 = vector.broadcast %63 : vector<8x1xf32> to vector<8x32xf32>
    %72 = arith.subf %57, %71 : vector<8x32xf32>
    %cst_38 = arith.constant 9.99999997E-7 : f32
    %73 = vector.broadcast %cst_38 : f32 to vector<8x1xf32>
    %74 = arith.addf %70, %73 : vector<8x1xf32>
    %75 = math.rsqrt %74 : vector<8x1xf32>
    %76 = vector.broadcast %75 : vector<8x1xf32> to vector<8x32xf32>
    %77 = arith.mulf %72, %76 : vector<8x32xf32>
    %78 = vector.broadcast %58 : vector<1x32xf32> to vector<8x32xf32>
    %79 = arith.mulf %77, %78 : vector<8x32xf32>
    %80 = vector.broadcast %59 : vector<1x32xf32> to vector<8x32xf32>
    %81 = arith.addf %79, %80 : vector<8x32xf32>
    %82 = arith.truncf %81 : vector<8x32xf32> to vector<8x32xbf16>
    %c0_39 = arith.constant 0 : index
    %c0_40 = arith.constant 0 : index
    %83 = vector.load %arg9[%c0_39, %c0_40] : memref<32x64xbf16, #tpu.memory_space<vmem>>, vector<32x64xbf16>
    %cst_41 = arith.constant dense<0.000000e+00> : vector<8x64xf32>
    %84 = tpu.matmul %82, %83, %cst_41 {dimension_numbers = #tpu.dot_dimension_numbers<[1], [0], [0], [1], [0, 0, 1, 1], [], []>} : vector<8x32xbf16>, vector<32x64xbf16>, vector<8x64xf32> -> vector<8x64xf32>
    %c0_42 = arith.constant 0 : index
    %c0_43 = arith.constant 0 : index
    %85 = vector.load %arg10[%c0_42, %c0_43] : memref<1x64xf32, #tpu.memory_space<vmem>>, vector<1x64xf32>
    %86 = vector.broadcast %85 : vector<1x64xf32> to vector<8x64xf32>
    %87 = arith.addf %84, %86 : vector<8x64xf32>
    %cst_44 = arith.constant 0.000000e+00 : f32
    %88 = vector.broadcast %cst_44 : f32 to vector<8x64xf32>
    %89 = arith.maximumf %87, %88 : vector<8x64xf32>
    %90 = arith.truncf %89 : vector<8x64xf32> to vector<8x64xbf16>
    %c0_45 = arith.constant 0 : index
    %c0_46 = arith.constant 0 : index
    %91 = vector.load %arg11[%c0_45, %c0_46] : memref<64x32xbf16, #tpu.memory_space<vmem>>, vector<64x32xbf16>
    %cst_47 = arith.constant dense<0.000000e+00> : vector<8x32xf32>
    %92 = tpu.matmul %90, %91, %cst_47 {dimension_numbers = #tpu.dot_dimension_numbers<[1], [0], [0], [1], [0, 0, 1, 1], [], []>} : vector<8x64xbf16>, vector<64x32xbf16>, vector<8x32xf32> -> vector<8x32xf32>
    %c0_48 = arith.constant 0 : index
    %c0_49 = arith.constant 0 : index
    %93 = vector.load %arg12[%c0_48, %c0_49] : memref<1x32xf32, #tpu.memory_space<vmem>>, vector<1x32xf32>
    %94 = vector.broadcast %93 : vector<1x32xf32> to vector<8x32xf32>
    %95 = arith.addf %92, %94 : vector<8x32xf32>
    %96 = arith.addf %95, %81 : vector<8x32xf32>
    %c0_50 = arith.constant 0 : index
    %c0_51 = arith.constant 0 : index
    %97 = vector.load %arg13[%c0_50, %c0_51] : memref<1x32xf32, #tpu.memory_space<vmem>>, vector<1x32xf32>
    %c0_52 = arith.constant 0 : index
    %c0_53 = arith.constant 0 : index
    %98 = vector.load %arg14[%c0_52, %c0_53] : memref<1x32xf32, #tpu.memory_space<vmem>>, vector<1x32xf32>
    %cst_54 = arith.constant dense<0.000000e+00> : vector<8xf32>
    %99 = vector.multi_reduction <add>, %96, %cst_54 [1] : vector<8x32xf32> to vector<8xf32>
    %100 = vector.shape_cast %99 : vector<8xf32> to vector<8x1xf32>
    %cst_55 = arith.constant 3.200000e+01 : f32
    %101 = vector.broadcast %cst_55 : f32 to vector<8x1xf32>
    %102 = arith.divf %100, %101 : vector<8x1xf32>
    %103 = vector.broadcast %102 : vector<8x1xf32> to vector<8x32xf32>
    %104 = arith.subf %96, %103 : vector<8x32xf32>
    %105 = arith.mulf %104, %104 : vector<8x32xf32>
    %cst_56 = arith.constant dense<0.000000e+00> : vector<8xf32>
    %106 = vector.multi_reduction <add>, %105, %cst_56 [1] : vector<8x32xf32> to vector<8xf32>
    %107 = vector.shape_cast %106 : vector<8xf32> to vector<8x1xf32>
    %cst_57 = arith.constant 3.200000e+01 : f32
    %108 = vector.broadcast %cst_57 : f32 to vector<8x1xf32>
    %109 = arith.divf %107, %108 : vector<8x1xf32>
    %110 = vector.broadcast %102 : vector<8x1xf32> to vector<8x32xf32>
    %111 = arith.subf %96, %110 : vector<8x32xf32>
    %cst_58 = arith.constant 9.99999997E-7 : f32
    %112 = vector.broadcast %cst_58 : f32 to vector<8x1xf32>
    %113 = arith.addf %109, %112 : vector<8x1xf32>
    %114 = math.rsqrt %113 : vector<8x1xf32>
    %115 = vector.broadcast %114 : vector<8x1xf32> to vector<8x32xf32>
    %116 = arith.mulf %111, %115 : vector<8x32xf32>
    %117 = vector.broadcast %97 : vector<1x32xf32> to vector<8x32xf32>
    %118 = arith.mulf %116, %117 : vector<8x32xf32>
    %119 = vector.broadcast %98 : vector<1x32xf32> to vector<8x32xf32>
    %120 = arith.addf %118, %119 : vector<8x32xf32>
    %c0_59 = arith.constant 0 : index
    %c0_60 = arith.constant 0 : index
    %c0_61 = arith.constant 0 : index
    %121 = vector.load %arg15[%c0_59, %c0_60, %c0_61] : memref<1x8x32xf32, #tpu.memory_space<vmem>>, vector<1x8x32xf32>
    %122 = vector.shape_cast %121 : vector<1x8x32xf32> to vector<8x32xf32>
    %123 = vector.shape_cast %120 : vector<8x32xf32> to vector<1x8x32xf32>
    tpu.vector_store %arg15[%c0_59, %c0_60, %c0_61], %123 {strides = array<i32>} : memref<1x8x32xf32, #tpu.memory_space<vmem>>, vector<1x8x32xf32>,
    return
  }
  func.func @transform_0(%arg0: i32) -> (i32, i32, i32) {
    %c0_i32 = arith.constant 0 : i32
    %c0_i32_0 = arith.constant 0 : i32
    %c0_i32_1 = arith.constant 0 : i32
    return %arg0, %c0_i32, %c0_i32_0 : i32, i32, i32
  }
  func.func @transform_1(%arg0: i32) -> (i32, i32) {
    %c0_i32 = arith.constant 0 : i32
    %c0_i32_0 = arith.constant 0 : i32
    %c0_i32_1 = arith.constant 0 : i32
    return %c0_i32, %c0_i32_0 : i32, i32
  }
  func.func @transform_2(%arg0: i32) -> (i32, i32) {
    %c0_i32 = arith.constant 0 : i32
    %c0_i32_0 = arith.constant 0 : i32
    %c0_i32_1 = arith.constant 0 : i32
    return %c0_i32, %c0_i32_0 : i32, i32
  }
  func.func @transform_3(%arg0: i32) -> (i32, i32) {
    %c0_i32 = arith.constant 0 : i32
    %c0_i32_0 = arith.constant 0 : i32
    %c0_i32_1 = arith.constant 0 : i32
    return %c0_i32, %c0_i32_0 : i32, i32
  }
  func.func @transform_4(%arg0: i32) -> (i32, i32) {
    %c0_i32 = arith.constant 0 : i32
    %c0_i32_0 = arith.constant 0 : i32
    %c0_i32_1 = arith.constant 0 : i32
    return %c0_i32, %c0_i32_0 : i32, i32
  }
  func.func @transform_5(%arg0: i32) -> (i32, i32) {
    %c0_i32 = arith.constant 0 : i32
    %c0_i32_0 = arith.constant 0 : i32
    %c0_i32_1 = arith.constant 0 : i32
    return %c0_i32, %c0_i32_0 : i32, i32
  }
  func.func @transform_6(%arg0: i32) -> (i32, i32) {
    %c0_i32 = arith.constant 0 : i32
    %c0_i32_0 = arith.constant 0 : i32
    %c0_i32_1 = arith.constant 0 : i32
    return %c0_i32, %c0_i32_0 : i32, i32
  }
  func.func @transform_7(%arg0: i32) -> (i32, i32) {
    %c0_i32 = arith.constant 0 : i32
    %c0_i32_0 = arith.constant 0 : i32
    %c0_i32_1 = arith.constant 0 : i32
    return %c0_i32, %c0_i32_0 : i32, i32
  }
  func.func @transform_8(%arg0: i32) -> (i32, i32) {
    %c0_i32 = arith.constant 0 : i32
    %c0_i32_0 = arith.constant 0 : i32
    %c0_i32_1 = arith.constant 0 : i32
    return %c0_i32, %c0_i32_0 : i32, i32
  }
  func.func @transform_9(%arg0: i32) -> (i32, i32) {
    %c0_i32 = arith.constant 0 : i32
    %c0_i32_0 = arith.constant 0 : i32
    %c0_i32_1 = arith.constant 0 : i32
    return %c0_i32, %c0_i32_0 : i32, i32
  }
  func.func @transform_10(%arg0: i32) -> (i32, i32) {
    %c0_i32 = arith.constant 0 : i32
    %c0_i32_0 = arith.constant 0 : i32
    %c0_i32_1 = arith.constant 0 : i32
    return %c0_i32, %c0_i32_0 : i32, i32
  }
  func.func @transform_11(%arg0: i32) -> (i32, i32) {
    %c0_i32 = arith.constant 0 : i32
    %c0_i32_0 = arith.constant 0 : i32
    %c0_i32_1 = arith.constant 0 : i32
    return %c0_i32, %c0_i32_0 : i32, i32
  }
  func.func @transform_12(%arg0: i32) -> (i32, i32) {
    %c0_i32 = arith.constant 0 : i32
    %c0_i32_0 = arith.constant 0 : i32
    %c0_i32_1 = arith.constant 0 : i32
    return %c0_i32, %c0_i32_0 : i32, i32
  }
  func.func @transform_13(%arg0: i32) -> (i32, i32) {
    %c0_i32 = arith.constant 0 : i32
    %c0_i32_0 = arith.constant 0 : i32
    %c0_i32_1 = arith.constant 0 : i32
    return %c0_i32, %c0_i32_0 : i32, i32
  }
  func.func @transform_14(%arg0: i32) -> (i32, i32, i32) {
    %c0_i32 = arith.constant 0 : i32
    %c0_i32_0 = arith.constant 0 : i32
    %c0_i32_1 = arith.constant 0 : i32
    return %arg0, %c0_i32, %c0_i32_0 : i32, i32, i32
  }
  func.func @transform_15(%arg0: i32) -> (i32, i32, i32, i32) {
    %c0_i32 = arith.constant 0 : i32
    %c0_i32_0 = arith.constant 0 : i32
    %c0_i32_1 = arith.constant 0 : i32
    %c0_i32_2 = arith.constant 0 : i32
    return %c0_i32, %arg0, %c0_i32_0, %c0_i32_1 : i32, i32, i32, i32
  }
}

</mosaic_0001>

<bundles_post_ra>
// kernel: tpu_custom_call.1
= control target key start
LH: loop header
LB: loop body
LE: loop exit
PB: predicated region body
PF: predicated region fallthrough
CT: control target
= control target key end

     0   :  { %s2305_s0 = inlined_call_operand.vmem [shape: f32[2,8,32], index: 0, kind: input, shape index: {}]   ;;  %s2306_s1 = inlined_call_operand.vmem [shape: bf16[32,32], index: 1, kind: input, shape index: {}]   ;;  %s2307_s2 = inlined_call_operand.vmem [shape: bf16[32,32], index: 2, kind: input, shape index: {}]   ;;  %s2308_s3 = inlined_call_operand.hbm [shape: bf16[32,32], index: 3, kind: input, shape index: {}]   ;;  %s2309_s4 = inlined_call_operand.hbm [shape: bf16[32,32], index: 4, kind: input, shape index: {}]   ;;  %s2310_s5 = inlined_call_operand.vmem [shape: f32[1,32], index: 5, kind: input, shape index: {}]   ;;  %s2311_s6 = inlined_call_operand.vmem [shape: f32[1,32], index: 6, kind: input, shape index: {}]   ;;  %s2312_s7 = inlined_call_operand.vmem [shape: f32[1,32], index: 7, kind: input, shape index: {}]   ;;  %s2313_s8 = inlined_call_operand.hbm [shape: bf16[32,64], index: 8, kind: input, shape index: {}]   ;;  %s2314_s9 = inlined_call_operand.vmem [shape: f32[1,64], index: 9, kind: input, shape index: {}]   ;;  %s2315_s10 = inlined_call_operand.vmem [shape: bf16[64,32], index: 10, kind: input, shape index: {}]   ;;  %s2316_s11 = inlined_call_operand.vmem [shape: f32[1,32], index: 11, kind: input, shape index: {}]   ;;  %s2317_s12 = inlined_call_operand.vmem [shape: f32[1,32], index: 12, kind: input, shape index: {}]   ;;  %s2318_s13 = inlined_call_operand.vmem [shape: f32[1,32], index: 13, kind: input, shape index: {}]   ;;  %s2319_s14 = inlined_call_operand.hbm [shape: f32[2,8,32], index: 14, kind: output, shape index: {0}]   ;;  %s2320_s15 = inlined_call_operand.hbm [shape: f32[2,2,8,8], index: 15, kind: output, shape index: {1}]  }
   0x1   :  { %2335 = sst [smem:[#allocation22_spill]] %s2305_s0 }
   0x2   :  { %2336 = sst [smem:[#allocation23_spill]] %s2317_s12 }
   0x3   :  { %2337 = sst [smem:[#allocation24_spill]] %s2318_s13 }
   0x4   :  { %2338 = sst [smem:[#allocation25_spill]] %s2319_s14 }
   0x5   :  { %2339 = sst [smem:[#allocation26_spill]] %s2320_s15 }
   0x6   :  { %21 = vsyncpa [#allocation3], 0 }
   0x7   :  { %22 = vsyncpa [#allocation6], 0 }
   0x8   :  { %23 = vsyncpa [#allocation4], 0 }
   0x9   :  { %25 = vsyncpa [#allocation4 + $0x1], 0 }
   0xa   :  { %26 = vsyncpa [#allocation10], 0 }
   0xb   :  { %28 = vsyncpa [#allocation10 + $0x1], 0  ;;  %s1935_s18 = smov 0   ;;  %s1937_s19 = smov 0  }
   0xc   :  { %s1939_s20 = smov 0   ;;  %s1941_s21 = smov 0  }
   0xd LB: > { %2340 = sst [smem:[#allocation15_spill]] %s1827_s18  ;;  %s1956_s22 = sadd.s32 4294967295, %s1839_s21   ;;  %s1839_s21 = sphi %s1941_s21, %s2369_s21   ;;  %s1835_s20 = sphi %s1939_s20, %s2371_s20   ;;  %s1831_s19 = sphi %s1937_s19, %s2373_s19   ;;  %s1827_s18 = sphi %s1935_s18, %s2372_s18  }
   0xe   : > { %2341 = sst [smem:[#allocation16_spill]] %s1835_s20  ;;  %s1388_s23 = sadd.s32 4294967294, %s1839_s21  }
   0xf   : > { %2342 = sst [smem:[#allocation17_spill]] %s1839_s21  ;;  %s1960_s24 = sadd.s32 1, %s1839_s21  }
  0x10   : > { %2343 = sst [smem:[#allocation18_spill]] %s1960_s24  ;;  %s340_s25 = sadd.s32 1, %s1835_s20 }
  0x11   : > { %s337_s26 = ssub.s32 %s1839_s21, %s1960_s24  ;;  %p350_p0 = scmp.ne.s32.totalorder %s1835_s20, %s1831_s19 }
  0x12   : > { %p338_p1 = scmp.eq.s32.totalorder %s337_s26, 0  ;;  %p351_p2 = scmp.eq.s32.totalorder %s1956_s22, 1 }
  0x13   : > { %p356_p3 = scmp.ne.s32.totalorder %s1831_s19, %s1827_s18  ;;  %p357_p4 = scmp.eq.s32.totalorder %s1388_s23, 1 }
  0x14   : > { %s1971_s27 = scalar_select %p338_p1, %s1835_s20, %s340_s25  }
  0x15   : > { %p1973_p5 = por %p351_p2, %p350_p0  ;;  %p1977_p6 = por %p357_p4, %p356_p3 }
  0x16   : > { %2344 = sst [smem:[#allocation19_spill]] %s1971_s27  ;;  %p1389_p7 = scmp.ge.s32.totalorder %s1839_s21, 1 }
  0x17   : > { %s2345_s28 = scalar_select %p1973_p5, 1, 0 }
  0x18   : > { %s2347_s29 = scalar_select %p1977_p6, 1, 0 }
  0x19   : > { %2346 = sst [smem:[#allocation20_spill]] %s2345_s28  ;;  %p390_p8 = scmp.lt.s32.totalorder %s1839_s21, 3 }
  0x1a   : > { %2348 = sst [smem:[#allocation21_spill]] %s2347_s29  ;;  %p2328_p9 = scmp.eq.s32.totalorder %s1956_s22, 0 }
  0x1b   : > { %p1984_p10 = pnand %p1389_p7, %p390_p8  ;;  %s1841_s16 = smov [#allocation5]  }
  0x1c   : > { %s421_s17 = sshll.u32 %s1841_s16, 4  ;;  %s1842_s25 = smov [#allocation2]   ;;  %s1990_s17 = int_to_ptr.vmem [resolvable:$true] %s421_s17 }
  0x1d   : > { %s2349_s30 = scalar_select %p1984_p10, 1, 0 }
  0x1e   : > { %p1559_p11 = pneg %p1984_p10  ;;  %s408_s26 = sshll.u32 %s1842_s25, 4  ;;  %s1998_s26 = int_to_ptr.vmem [resolvable:$true] %s408_s26 }
  0x1f   : > { %s1843_s27 = smov [#allocation7]   ;;  %s1653_s18 = scalar_lea.hbm %s2309_s4, 256 }
  0x20   : > { %p1994_p12 = pnand %p2328_p9, %p1559_p11  ;;  %s2000_s20 = sshll.u32 %s1843_s27, 4  ;;  %s444_s20 = int_to_ptr.vmem [resolvable:$true] %s2000_s20 }
  0x21   : > { %p1654_p13 = scmp.ne.s32.totalorder %s2309_s4, %s1653_s18  ;;  %p1660_p3 = scmp.lt.u32.totalorder %s1653_s18, %s2309_s4 }
  0x22   : > { %p2010_p0 = pneg %p1994_p12 }
  0x24   : > { %p1656_p1 = pnand %p2010_p0, %p1654_p13 }
  0x26   : > { %p1657_p2 = pneg %p1656_p1 }
  0x28   : > { %p1662_p4 = pnand %p1660_p3, %p1657_p2 }
  0x2a   : > { %1665 = shalt.err (!%p1662_p4)
}
  0x2b   : > { %s1666_s21 = scalar_lea.vmem %s1990_s17, 256  ;;  %p1674_p9 = scmp.lt.s32.totalorder %s1990_s17, %s1990_s17 }
  0x2c   : > { %p1667_p7 = scmp.ne.s32.totalorder %s1990_s17, %s1666_s21  ;;  %p1675_p6 = scmp.lt.s32.totalorder %s1666_s21, %s1666_s21 }
  0x2e   : > { %p1669_p8 = pnand %p1667_p7, %p2010_p0  ;;  %p1676_p13 = por %p1675_p6, %p1674_p9 }
  0x30   : > { %p1670_p11 = pneg %p1669_p8 }
  0x32   : > { %p1677_p1 = pnand %p1676_p13, %p1670_p11 }
  0x34   : > { %1680 = shalt.err (!%p1677_p1)
}
  0x35   : > { %s1844_s24 = smov 64   ;;  %s1845_s18 = smov 4  }
  0x36   : > { %1565 = dma.hbm_to_vmem [thread:$0]  (!%p1994_p12), %s2309_s4, 256, %s1990_s17, [#allocation6], %s1844_s24, %s1844_s24, %s1845_s18  }
  0x37   : > { %s1681_s21 = scalar_lea.hbm %s2308_s3, 256 }
  0x38   : > { %p1682_p6 = scmp.ne.s32.totalorder %s2308_s3, %s1681_s21  ;;  %p1688_p3 = scmp.lt.u32.totalorder %s1681_s21, %s2308_s3 }
  0x3a   : > { %p1684_p9 = pnand %p1682_p6, %p2010_p0 }
  0x3c   : > { %p1685_p2 = pneg %p1684_p9 }
  0x3e   : > { %p1690_p4 = pnand %p1688_p3, %p1685_p2 }
  0x40   : > { %1693 = shalt.err (!%p1690_p4)
}
  0x41   : > { %s1694_s17 = scalar_lea.vmem %s1998_s26, 256  ;;  %p1702_p13 = scmp.lt.s32.totalorder %s1998_s26, %s1998_s26 }
  0x42   : > { %p1695_p7 = scmp.ne.s32.totalorder %s1998_s26, %s1694_s17  ;;  %p1703_p1 = scmp.lt.s32.totalorder %s1694_s17, %s1694_s17 }
  0x44   : > { %p1697_p8 = pnand %p1695_p7, %p2010_p0  ;;  %p1704_p6 = por %p1703_p1, %p1702_p13 }
  0x46   : > { %p1698_p11 = pneg %p1697_p8 }
  0x48   : > { %p1705_p9 = pnand %p1704_p6, %p1698_p11 }
  0x4a   : > { %1708 = shalt.err (!%p1705_p9)
}
  0x4b   : > { %1562 = dma.hbm_to_vmem [thread:$0]  (!%p1994_p12), %s2308_s3, 256, %s1998_s26, [#allocation3], %s1844_s24, %s1844_s24, %s1845_s18  }
  0x4c   : > { %s1709_s29 = scalar_lea.hbm %s2313_s8, 256 }
  0x4d   : > { %p1710_p2 = scmp.ne.s32.totalorder %s2313_s8, %s1709_s29  ;;  %p1716_p7 = scmp.lt.u32.totalorder %s1709_s29, %s2313_s8 }
  0x4f   : > { %p1712_p3 = pnand %p1710_p2, %p2010_p0 }
  0x51   : > { %p1713_p4 = pneg %p1712_p3 }
  0x53   : > { %p1718_p8 = pnand %p1716_p7, %p1713_p4 }
  0x55   : > { %1721 = shalt.err (!%p1718_p8)
}
  0x56   : > { %s1722_s17 = scalar_lea.vmem %s444_s20, 256  ;;  %p1730_p6 = scmp.lt.s32.totalorder %s444_s20, %s444_s20 }
  0x57   : > { %p1723_p11 = scmp.ne.s32.totalorder %s444_s20, %s1722_s17  ;;  %p1731_p9 = scmp.lt.s32.totalorder %s1722_s17, %s1722_s17 }
  0x59   : > { %p1725_p13 = pnand %p1723_p11, %p2010_p0  ;;  %p1732_p5 = por %p1731_p9, %p1730_p6 }
  0x5b   : > { %p1726_p1 = pneg %p1725_p13 }
  0x5d   : > { %p1733_p10 = pnand %p1732_p5, %p1726_p1 }
  0x5f   : > { %1736 = shalt.err (!%p1733_p10)
}
  0x60   : > { %1568 = dma.hbm_to_vmem [thread:$0]  (!%p1994_p12), %s2313_s8, 256, %s444_s20, [#allocation6], %s1844_s24, %s1844_s24, %s1845_s18  }
  0x61   : > { %p2352_p2 = scmp.ne.s32.totalorder %s2349_s30, 0 }
  0x62   : > { %p2353_p0 = scmp.eq.s32.totalorder (!%p2352_p2), %s1956_s22, 0 }
  0x63   : > { %481 = sbr.rel (%p2352_p2) target bundleno = 2607 (0xa2f), region = 76 }
  0x6a   : > { %1810 = dma.done.wait (%p2353_p0), [#allocation3], 256   ;;  %p2354_p3 = pmov %p2353_p0 }
  0x6b   : > { %p2355_p5 = pmov %p2353_p0 }
  0x6c   : > { %1812 = vsyncadd (%p2354_p3), [#allocation3], 4294967040 }
  0x6d   : > { %1814 = dma.done.wait (%p2355_p5), [#allocation6], 512   ;;  %p2356_p10 = pmov %p2353_p0 }
  0x6e   : > { %p541_p4 = scmp.lt.s32.totalorder %s1956_s22, 1  ;;  %v1846_v0 = vmov 0.0   ;;  %vm1847_vm0 = vmmov 0   ;;  %v1627_v1 = vld [vmem:[%s2307_s2] sm:$0xff]   ;;  %s2357_s0 = sld [smem:[#allocation22_spill]]  ;;  %v1628_v2 = vld [vmem:[%s2307_s2 + $0x8] sm:$0xff]  }
  0x6f   : > { %1816 = vsyncadd (%p2356_p10), [#allocation6], 4294966784  ;;  %1475 = vmatprep.subr.bf16.mxu1 %v1846_v0  ;;  %1467 = vmatprep.subr.bf16.mxu0 %v1846_v0  ;;  %v1629_v3 = vld [vmem:[%s2306_s1] sm:$0xff]   ;;  %vm564_vm1 = vcmask 261120   ;;  %v1630_v5 = vld [vmem:[%s2306_s1 + $0x8] sm:$0xff]   ;;  %vm723_vm2 = vcmask 130048  }
  0x70   : > { %1479 = vmatprep.mubr.msk.bf16.mxu1 %vm1847_vm0, %v1846_v0  ;;  %s542_s14 = scalar_select %p541_p4, %s1956_s22, 1  ;;  %1471 = vmatprep.mubr.msk.bf16.mxu0 %vm1847_vm0, %v1846_v0  ;;  %v1631_v18 = vld [vmem:[#allocation2] sm:$0xff]   ;;  %v1632_v19 = vld [vmem:[#allocation2 + $0x8] sm:$0xff]   ;;  %vm770_vm3 = vcmask 64512   ;;  %vm787_vm4 = vcmask 1043456   ;;  %v1633_v59 = vld [vmem:[#allocation5] sm:$0xff]  }
  0x71   : > { %1476 = vmatpush3.bf16.msra.mxu1 %v1627_v1  ;;  %1468 = vmatpush3.bf16.msra.mxu0 %v1629_v3  ;;  %s1848_s21 = smov 112   ;;  %s2154_s17 = sand.u32 1, %s1831_s19   ;;  %v1634_v1 = vld [vmem:[#allocation5 + $0x8] sm:$0xff]   ;;  %vm1157_vm5 = vcmask 523264  }
  0x72   : > { %s1400_s20 = sshll.u32 %s542_s14, 3  ;;  %1477 = vmatprep.subr.bf16.mxu1 %v1846_v0  ;;  %1469 = vmatprep.subr.bf16.mxu0 %v1846_v0  ;;  %s1399_s26 = sshll.u32 %s2154_s17, 4 }
  0x73   : > { %s2157_s12 = scalar_lea.vmem [#allocation9], %s1399_s26  ;;  %s1849_s14 = smov 16  }
  0x74   : > { %s544_s13 = scalar_lea.vmem %s2357_s0, %s1400_s20  ;;  %s2358_s24 = sld [smem:[#allocation20_spill]] }
  0x75   : > { %v2113_v4 = vld [vmem:[%s544_s13] sm:$0xff]  ;;  %1478 = vmatpush3.bf16.msra.mxu1 %v1628_v2  ;;  %1470 = vmatpush3.bf16.msra.mxu0 %v1630_v5  ;;  %s2334_s18 = sshll.u32 %s1956_s22, 7  ;;  %s2359_s28 = sld [smem:[#allocation26_spill]] }
  0x76   : > { %v547_v6 = vpack.c.bf16 %v2113_v4, %v2113_v4  ;;  %1491 = vmatprep.subr.bf16.mxu1 %v1846_v0  ;;  %1483 = vmatprep.subr.bf16.mxu0 %v1846_v0  ;;  %s1263_s16 = sshll.u32 %s2157_s12, 4  ;;  %s1238_s25 = scalar_lea.sflag [#allocation10], %s2154_s17  ;;  %s2223_s16 = int_to_ptr.vmem [resolvable:$true] %s1263_s16 }
  0x77   : > { %s1737_s27 = scalar_lea.vmem %s2223_s16, 256 }
  0x78   : > { %1480 = vmatmul.mubr.msk.bf16.vlgmr.msra.gmra.mrb[0].mxu1 %vm564_vm1, %v547_v6  ;;  %1472 = vmatmul.mubr.msk.bf16.vlgmr.msra.gmra.mrb[0].mxu0 %vm564_vm1, %v547_v6  ;;  %p1738_p12 = scmp.ne.s32.totalorder %s2223_s16, %s1737_s27 }
  0x79   : > { %1493 = vmatprep.mubr.msk.bf16.mxu1 %vm1847_vm0, %v1846_v0  ;;  %1487 = vmatprep.mubr.msk.bf16.mxu0 %vm1847_vm0, %v1846_v0 }
  0x7a   : > { %1484 = vmatpush3.bf16.msra.mxu0 %v1631_v18  ;;  %p2360_p7 = scmp.ne.s32.totalorder %s2358_s24, 0 }
  0x7b   : > { %1485 = vmatprep.subr.bf16.mxu0 %v1846_v0  ;;  %s2220_s29 = scalar_lea.hbm %s2359_s28, %s2334_s18 }
  0x7c   : > { %p1739_p8 = pnand %p1738_p12, %p2360_p7 }
  0x7e   : > { %1486 = vmatpush3.bf16.msra.mxu0 %v1632_v19  ;;  %p1740_p11 = pneg %p1739_p8 }
  0x7f   : > { %1497 = vmatprep.subr.bf16.mxu0 %v1846_v0 }
  0x81   : > { %1488 = vmatmul.mubr.msk.bf16.vlgmr.msra.gmra.mrb[4].mxu0 %vm564_vm1, %v547_v6 }
  0x82   : > { %1499 = vmatprep.mubr.msk.bf16.mxu0 %vm1847_vm0, %v1846_v0 }
 0x14b   : > { %v658_v7 = vpop.f32.mrb[0].mxu1  ;;  %v602_v11 = vpop.f32.mrb[0].mxu0 }
 0x14c   : > { %v721_v8 = vpack.c.bf16 %v658_v7, %v658_v7  ;;  %v1481_v9 = vpop.f32.mrb[1].mxu1  ;;  %v720_v14 = vpack.c.bf16 %v602_v11, %v602_v11  ;;  %v1473_v15 = vpop.f32.mrb[1].mxu0 }
 0x14d   : > { %v661_v10 = vpop.f32.mrb[2].mxu1  ;;  %v605_v16 = vpop.f32.mrb[2].mxu0 }
 0x14e   : > { %v728_v12 = vsel %vm723_vm2, %v721_v8, 0  ;;  %835 = vrot.lane.b32.xlu0 %v721_v8, %s1848_s21  ;;  %v1482_v13 = vpop.f32.mrb[3].mxu1  ;;  %v1474_v17 = vpop.f32.mrb[3].mxu0  ;;  %v1415_v10 = vld [vmem:[%s2310_s5] ss:$0 sm:$0xff] }
 0x14f   : > { %1492 = vmatpush3.bf16.xpose.msra.mxu1 %v728_v12 }
 0x150   : > { %1503 = vmatprep.subr.bf16.mxu1 %v1846_v0 }
 0x152   : > { %832 = vrot.lane.b32.xlu0 %v720_v14, %s1848_s21 }
 0x154   : > { %v714_v38 = vpop.f32.mrb[4].mxu0 }
 0x155   : > { %v1489_v39 = vpop.f32.mrb[5].mxu0  ;;  %v722_v42 = vpack.c.bf16 %v714_v38, %v714_v38  ;;  %v1421_v38 = vld [vmem:[%s2314_s9] ss:$0 sm:$0xff] }
 0x156   : > { %1494 = vmatmul.mubr.msk.bf16.vlgmr.msra.gmra.mrb[4].mxu1 %vm723_vm2, %v720_v14  ;;  %v717_v40 = vpop.f32.mrb[6].mxu0 }
 0x157   : > { %1505 = vmatprep.mubr.msk.bf16.mxu1 %vm1847_vm0, %v1846_v0  ;;  %v1490_v41 = vpop.f32.mrb[7].mxu0  ;;  %v789_v43 = vsel %vm787_vm4, %v722_v42, 0 }
 0x158   : > { %1498 = vmatpush3.bf16.msra.mxu0 %v789_v43 }
 0x159   : > { %1509 = vmatprep.subr.bf16.mxu0 %v1846_v0 }
 0x1c0   : > { %v836_v20 = vpop.permute.xlu0 %835 }
 0x1c1   : > { %v841_v21 = vsel %vm723_vm2, %v836_v20, 0 }
 0x1c2   : > { %1504 = vmatpush3.bf16.xpose.msra.mxu1 %v841_v21 }
 0x1c3   : > { %1515 = vmatprep.subr.bf16.mxu1 %v1846_v0 }
 0x1c4   : > { %v833_v22 = vpop.permute.xlu0 %832 }
 0x1c9   : > { %1506 = vmatmul.mubr.msk.bf16.vlgmr.msra.gmra.mrb[8].mxu1 %vm723_vm2, %v833_v22 }
 0x1ca   : > { %1519 = vmatprep.mubr.msk.bf16.mxu1 %vm1847_vm0, %v1846_v0  ;;  %1516 = vmatpush3.bf16.msra.mxu1 %v1633_v59 }
 0x1cb   : > { %1517 = vmatprep.subr.bf16.mxu1 %v1846_v0 }
 0x1ce   : > { %1518 = vmatpush3.bf16.msra.mxu1 %v1634_v1 }
 0x1cf   : > { %1531 = vmatprep.subr.bf16.mxu1 %v1846_v0 }
 0x229   : > { %v764_v23 = vpop.f32.mrb[4].mxu1 }
 0x22a   : > { %v1495_v24 = vpop.f32.mrb[5].mxu1  ;;  %v771_v25 = vsel %vm770_vm3, %v764_v23, -inf }
 0x22b   : > { %772 = vmax.xlane.f32.xlu1 %v771_v25  ;;  %v767_v26 = vpop.f32.mrb[6].mxu1  ;;  %v1636_v24 = vld [vmem:[#allocation7 + $0x8] sm:$0xff]  }
 0x22c   : > { %v1496_v27 = vpop.f32.mrb[7].mxu1  ;;  %v1638_v25 = vld [vmem:[%s2315_s10 + $0x8] sm:$0xff]  }
 0x29c   : > { %v877_v28 = vpop.f32.mrb[8].mxu1 }
 0x29d   : > { %v1507_v29 = vpop.f32.mrb[9].mxu1  ;;  %v883_v30 = vsel %vm770_vm3, %v877_v28, -inf }
 0x29e   : > { %884 = vmax.xlane.f32.xlu1 %v883_v30  ;;  %v880_v31 = vpop.f32.mrb[10].mxu1  ;;  %v1419_v30 = vld [vmem:[%s2311_s6] ss:$0 sm:$0xff] }
 0x29f   : > { %v1508_v32 = vpop.f32.mrb[11].mxu1 }
 0x2a0   : > { %v1420_v32 = vld [vmem:[%s2312_s7] ss:$0 sm:$0xff] }
 0x2b8   : > { %v773_v33 = vpop.xlane.xlu1 %772 }
 0x2b9   : > { %v774_v34 = vsub.f32 %v764_v23, %v773_v33  ;;  %v1635_v23 = vld [vmem:[#allocation7] sm:$0xff]  }
 0x2bb   : > { %v775_v35 = vmul.f32 1.442695, %v774_v34 }
 0x2bd   : > { %1641 = vpow2.f32 %v775_v35 }
 0x2c7   : > { %v1642_v36 = vpop.eup %1641 }
 0x2c8   : > { %v777_v37 = vsel %vm770_vm3, %v1642_v36, 0.0 }
 0x2c9   : > { %778 = vadd.xlane.f32.xlu0 %v777_v37  ;;  %v1640_v37 = vld [vmem:[%s2315_s10 + $0x18] sm:$0xff]  }
 0x32b   : > { %v885_v44 = vpop.xlane.xlu1 %884 }
 0x32c   : > { %v886_v45 = vsub.f32 %v877_v28, %v885_v44 }
 0x32e   : > { %v887_v46 = vmul.f32 1.442695, %v886_v45 }
 0x330   : > { %1643 = vpow2.f32 %v887_v46 }
 0x33a   : > { %v1644_v47 = vpop.eup %1643 }
 0x33b   : > { %v889_v48 = vsel %vm770_vm3, %v1644_v47, 0.0 }
 0x33c   : > { %890 = vadd.xlane.f32.xlu1 %v889_v48 }
 0x34d   : > { %898 = vrot.lane.b32.xlu1 %v722_v42, %s1848_s21  ;;  %s1850_s21 = smov [#allocation9]  }
 0x34e   : > { %s1741_s26 = sshll.u32 %s1850_s21, 4  ;;  %s1742_s26 = int_to_ptr.vmem [resolvable:$false] %s1741_s26 }
 0x34f   : > { %p1744_p13 = scmp.lt.s32.totalorder %s2223_s16, %s1742_s26 }
 0x356   : > { %v779_v49 = vpop.xlane.xlu0 %778 }
 0x357   : > { %1645 = vrcp.f32 %v779_v49 }
 0x361   : > { %v1646_v50 = vpop.eup %1645 }
 0x362   : > { %v781_v51 = vmul.f32 %v1646_v50, %v1642_v36  ;;  %v1639_v36 = vld [vmem:[%s2315_s10 + $0x10] sm:$0xff]  }
 0x364   : > { %v783_v52 = vpack.c.bf16 %v781_v51, %v781_v51  ;;  %782 = vst.msk [vmem:[%s2157_s12] sm:$0xff] %vm770_vm3, %v781_v51 }
 0x366   : > { %1500 = vmatmul.mubr.msk.bf16.vlgmr.msra.gmra.mrb[8].mxu0 %vm770_vm3, %v783_v52 }
 0x367   : > { %1511 = vmatprep.mubr.msk.bf16.mxu0 %vm1847_vm0, %v1846_v0 }
 0x3c9   : > { %v891_v53 = vpop.xlane.xlu1 %890 }
 0x3ca   : > { %1647 = vrcp.f32 %v891_v53 }
 0x3cd   : > { %v899_v54 = vpop.permute.xlu1 %898 }
 0x3ce   : > { %v904_v55 = vsel %vm787_vm4, %v899_v54, 0 }
 0x3cf   : > { %1510 = vmatpush3.bf16.msra.mxu0 %v904_v55 }
 0x3d0   : > { %1523 = vmatprep.subr.bf16.mxu0 %v1846_v0 }
 0x3d4   : > { %v1648_v56 = vpop.eup %1647 }
 0x3d5   : > { %v893_v57 = vmul.f32 %v1648_v56, %v1644_v47 }
 0x3d7   : > { %v896_v58 = vpack.c.bf16 %v893_v57, %v893_v57  ;;  %1413 = vst.msk [vmem:[%s2157_s12 + $0x8] sm:$0xff] %vm770_vm3, %v893_v57 }
 0x3d9   : > { %1512 = vmatmul.mubr.msk.bf16.vlgmr.msra.gmra.mrb[12].mxu0 %vm770_vm3, %v896_v58 }
 0x3da   : > { %1527 = vmatprep.mubr.msk.bf16.mxu0 %vm1847_vm0, %v1846_v0  ;;  %1524 = vmatpush3.bf16.msra.mxu0 %v1635_v23 }
 0x3db   : > { %1525 = vmatprep.subr.bf16.mxu0 %v1846_v0 }
 0x3de   : > { %1526 = vmatpush3.bf16.msra.mxu0 %v1636_v24 }
 0x439   : > { %v825_v60 = vpop.f32.mrb[8].mxu0 }
 0x43a   : > { %v1501_v61 = vpop.f32.mrb[9].mxu0 }
 0x43b   : > { %v828_v62 = vpop.f32.mrb[10].mxu0 }
 0x43c   : > { %v1502_v63 = vpop.f32.mrb[11].mxu0 }
 0x4ac   : > { %v940_v2 = vpop.f32.mrb[12].mxu0 }
 0x4ad   : > { %947 = vrot.lane.b32.xlu1 %v940_v2, %s1849_s14  ;;  %v1513_v3 = vpop.f32.mrb[13].mxu0  ;;  %s1743_s14 = scalar_lea.vmem %s1742_s26, 512 }
 0x4ae   : > { %v943_v5 = vpop.f32.mrb[14].mxu0  ;;  %p1745_p1 = scmp.lt.s32.totalorder %s1743_s14, %s1737_s27 }
 0x4af   : > { %v1514_v6 = vpop.f32.mrb[15].mxu0 }
 0x4b0   : > { %p1746_p6 = por %p1745_p1, %p1744_p13 }
 0x4b2   : > { %p1747_p9 = pnand %p1746_p6, %p1740_p11 }
 0x51f   : > { %v948_v7 = vpop.permute.xlu1 %947 }
 0x520   : > { %v950_v8 = vsel %vm723_vm2, %v825_v60, %v948_v7 }
 0x521   : > { %v951_v9 = vpack.c.bf16 %v950_v8, %v950_v8 }
 0x523   : > { %1520 = vmatmul.mubr.msk.bf16.vlgmr.msra.gmra.mrb[12].mxu1 %vm564_vm1, %v951_v9 }
 0x524   : > { %1539 = vmatprep.mubr.msk.bf16.mxu1 %vm1847_vm0, %v1846_v0 }
 0x5f6   : > { %v1012_v11 = vpop.f32.mrb[12].mxu1 }
 0x5f7   : > { %v1013_v12 = vadd.f32 %v1415_v10, %v1012_v11  ;;  %v1521_v13 = vpop.f32.mrb[13].mxu1 }
 0x5f8   : > { %v1015_v14 = vpop.f32.mrb[14].mxu1 }
 0x5f9   : > { %v1522_v15 = vpop.f32.mrb[15].mxu1  ;;  %v1018_v16 = vadd.f32 %v1013_v12, %v2113_v4  ;;  %v1637_v4 = vld [vmem:[%s2315_s10] sm:$0xff]  }
 0x5fa   : > { %1532 = vmatpush3.bf16.msra.mxu1 %v1637_v4 }
 0x5fb   : > { %v1021_v17 = vsel %vm564_vm1, %v1018_v16, 0.0  ;;  %1533 = vmatprep.subr.bf16.mxu1 %v1846_v0 }
 0x5fc   : > { %1022 = vadd.xlane.f32.xlu1 %v1021_v17 }
 0x5fe   : > { %1534 = vmatpush3.bf16.msra.mxu1 %v1638_v25 }
 0x5ff   : > { %1535 = vmatprep.subr.bf16.mxu1 %v1846_v0 }
 0x602   : > { %1536 = vmatpush3.bf16.msra.mxu1 %v1639_v36 }
 0x603   : > { %1537 = vmatprep.subr.bf16.mxu1 %v1846_v0  ;;  %v1425_v0 = vld [vmem:[%s2316_s11] ss:$0 sm:$0xff] }
 0x606   : > { %1538 = vmatpush3.bf16.msra.mxu1 %v1640_v37 }
 0x689   : > { %v1023_v18 = vpop.xlane.xlu1 %1022 }
 0x68a   : > { %v1025_v19 = vmul.f32 0.03125, %v1023_v18 }
 0x68c   : > { %v1026_v20 = vsub.f32 %v1018_v16, %v1025_v19 }
 0x68e   : > { %v1027_v21 = vmul.f32 %v1026_v20, %v1026_v20 }
 0x690   : > { %v1028_v22 = vsel %vm564_vm1, %v1027_v21, 0.0 }
 0x691   : > { %1029 = vadd.xlane.f32.xlu0 %v1028_v22 }
 0x71e   : > { %v1030_v26 = vpop.xlane.xlu0 %1029 }
 0x71f   : > { %v1031_v27 = vmul.f32 0.03125, %v1030_v26 }
 0x721   : > { %v1032_v28 = vadd.f32 1e-06, %v1031_v27 }
 0x723   : > { %1649 = vrsqrt.f32 %v1032_v28 }
 0x72d   : > { %v1650_v29 = vpop.eup %1649 }
 0x72e   : > { %v1034_v31 = vmul.f32 %v1650_v29, %v1026_v20 }
 0x730   : > { %v1041_v33 = vmul.f32 %v1419_v30, %v1034_v31 }
 0x732   : > { %v1048_v34 = vadd.f32 %v1420_v32, %v1041_v33 }
 0x734   : > { %v1049_v35 = vpack.c.bf16 %v1048_v34, %v1048_v34 }
 0x736   : > { %1528 = vmatmul.mubr.msk.bf16.vlgmr.msra.gmra.mrb[16].mxu0 %vm564_vm1, %v1049_v35 }
 0x809   : > { %v1110_v39 = vpop.f32.mrb[16].mxu0 }
 0x80a   : > { %v1111_v40 = vadd.f32 %v1421_v38, %v1110_v39  ;;  %v1529_v41 = vpop.f32.mrb[17].mxu0 }
 0x80b   : > { %v1113_v42 = vpop.f32.mrb[18].mxu0 }
 0x80c   : > { %v1116_v43 = vmax.f32 %v1111_v40, 0.0  ;;  %v1530_v44 = vpop.f32.mrb[19].mxu0 }
 0x80e   : > { %v1117_v45 = vpack.c.bf16 %v1116_v43, %v1116_v43 }
 0x810   : > { %1540 = vmatmul.mubr.msk.bf16.vlgmr.msra.gmra.mrb[16].mxu1 %vm1157_vm5, %v1117_v45 }
 0x8e3   : > { %v1195_v46 = vpop.f32.mrb[16].mxu1 }
 0x8e4   : > { %v1196_v47 = vadd.f32 %v1425_v0, %v1195_v46  ;;  %v1541_v48 = vpop.f32.mrb[17].mxu1 }
 0x8e5   : > { %v1198_v49 = vpop.f32.mrb[18].mxu1 }
 0x8e6   : > { %v1542_v50 = vpop.f32.mrb[19].mxu1  ;;  %v1201_v51 = vadd.f32 %v1196_v47, %v1048_v34 }
 0x8e8   : > { %v1204_v52 = vsel %vm564_vm1, %v1201_v51, 0.0 }
 0x8e9   : > { %1205 = vadd.xlane.f32.xlu0 %v1204_v52 }
 0x976   : > { %v1206_v53 = vpop.xlane.xlu0 %1205 }
 0x977   : > { %v1207_v54 = vmul.f32 0.03125, %v1206_v53 }
 0x979   : > { %v1208_v55 = vsub.f32 %v1201_v51, %v1207_v54 }
 0x97b   : > { %v1209_v56 = vmul.f32 %v1208_v55, %v1208_v55 }
 0x97d   : > { %v1210_v57 = vsel %vm564_vm1, %v1209_v56, 0.0 }
 0x97e   : > { %1211 = vadd.xlane.f32.xlu0 %v1210_v57 }
 0x97f   : > { %1750 = shalt.err (!%p1747_p9)
}
 0x980   : > { %s1751_s12 = scalar_lea.hbm %s2220_s29, 256  ;;  %s1755_s23 = scalar_lea.hbm %s2359_s28, 512 }
 0x981   : > { %p1752_p2 = scmp.ne.s32.totalorder %s2220_s29, %s1751_s12  ;;  %p1756_p5 = scmp.lt.u32.totalorder %s2220_s29, %s2359_s28 }
 0x982   : > { %p1757_p10 = scmp.lt.u32.totalorder %s1755_s23, %s1751_s12  ;;  %p1759_p12 = scmp.lt.u32.totalorder %s1751_s12, %s2220_s29 }
 0x983   : > { %p1753_p0 = pnand %p1752_p2, %p2360_p7 }
 0x984   : > { %p1758_p4 = por %p1757_p10, %p1756_p5 }
 0x985   : > { %p1754_p3 = pneg %p1753_p0 }
 0x986   : > { %p1760_p8 = por %p1759_p12, %p1758_p4 }
 0x988   : > { %p1761_p11 = pnand %p1760_p8, %p1754_p3 }
 0x98a   : > { %1764 = shalt.err (!%p1761_p11)
}
 0x98b   : > { %s1851_s27 = smov 128   ;;  %s1852_s21 = smov 256  }
 0x98c   : > { %s1853_s26 = smov 8   ;;  %s1398_s14 = sshll.u32 %s2154_s17, 3 }
 0x98d   : > { %1556 = dma.vmem_to_hbm [thread:$0]  (%p2360_p7), %s2223_s16, 256, %s2220_s29, %s1238_s25, %s1851_s27, %s1852_s21, %s1853_s26  }
 0x98e   : > { %s2361_s30 = sld [smem:[#allocation23_spill]]  ;;  %s2362_s15 = sld [smem:[#allocation24_spill]] }
 0x98f   : > { %s533_s18 = scalar_lea.vmem [#allocation8], %s1398_s14  ;;  %s2363_s29 = sshll.u32 %s1956_s22, 7 }
 0x990   : > { %s1251_s0 = sshll.u32 %s533_s18, 4  ;;  %s2364_s27 = sld [smem:[#allocation25_spill]]  ;;  %s2263_s0 = int_to_ptr.vmem [resolvable:$true] %s1251_s0 }
 0x991   : > { %s1233_s26 = scalar_lea.sflag [#allocation4], %s2154_s17  ;;  %s1765_s12 = scalar_lea.vmem %s2263_s0, 128 }
 0x992   : > { %p1766_p13 = scmp.ne.s32.totalorder %s2263_s0, %s1765_s12  ;;  %s1854_s14 = smov [#allocation8]  }
 0x993   : > { %s1769_s22 = sshll.u32 %s1854_s14, 4  ;;  %s1770_s22 = int_to_ptr.vmem [resolvable:$false] %s1769_s22 }
 0x994   : > { %v1431_v62 = vld [vmem:[%s2361_s30] ss:$0 sm:$0xff]  ;;  %p1767_p1 = pnand %p1766_p13, %p2360_p7  ;;  %s1771_s20 = scalar_lea.vmem %s1770_s22, 256 }
 0x995   : > { %v1432_v1 = vld [vmem:[%s2362_s15] ss:$0 sm:$0xff]  ;;  %p1772_p9 = scmp.lt.s32.totalorder %s2263_s0, %s1770_s22  ;;  %p1773_p2 = scmp.lt.s32.totalorder %s1771_s20, %s1765_s12 }
 0x996   : > { %s2261_s21 = scalar_lea.hbm %s2364_s27, %s2363_s29  ;;  %p1768_p6 = pneg %p1767_p1 }
 0x997   : > { %p1774_p0 = por %p1773_p2, %p1772_p9 }
 0x999   : > { %p1775_p3 = pnand %p1774_p0, %p1768_p6 }
 0xa0b   : > { %v1212_v58 = vpop.xlane.xlu0 %1211 }
 0xa0c   : > { %v1213_v59 = vmul.f32 0.03125, %v1212_v58 }
 0xa0e   : > { %v1214_v60 = vadd.f32 1e-06, %v1213_v59 }
 0xa10   : > { %1651 = vrsqrt.f32 %v1214_v60 }
 0xa1a   : > { %v1652_v61 = vpop.eup %1651 }
 0xa1b   : > { %v1216_v63 = vmul.f32 %v1652_v61, %v1208_v55 }
 0xa1d   : > { %v1223_v2 = vmul.f32 %v1431_v62, %v1216_v63 }
 0xa1f   : > { %v1230_v3 = vadd.f32 %v1432_v1, %v1223_v2 }
 0xa21   : > { %1231 = vst.msk [vmem:[%s533_s18] sm:$0xff] %vm564_vm1, %v1230_v3 }
 0xa22   : > { %1778 = shalt.err (!%p1775_p3)
}
 0xa23   : > { %s1779_s17 = scalar_lea.hbm %s2261_s21, 128  ;;  %s1783_s23 = scalar_lea.hbm %s2364_s27, 256 }
 0xa24   : > { %p1780_p5 = scmp.ne.s32.totalorder %s2261_s21, %s1779_s17  ;;  %p1784_p12 = scmp.lt.u32.totalorder %s2261_s21, %s2364_s27 }
 0xa25   : > { %p1785_p8 = scmp.lt.u32.totalorder %s1783_s23, %s1779_s17  ;;  %p1787_p13 = scmp.lt.u32.totalorder %s1779_s17, %s2261_s21 }
 0xa26   : > { %p1781_p10 = pnand %p1780_p5, %p2360_p7 }
 0xa27   : > { %p1786_p11 = por %p1785_p8, %p1784_p12 }
 0xa28   : > { %p1782_p4 = pneg %p1781_p10 }
 0xa29   : > { %p1788_p1 = por %p1787_p13, %p1786_p11 }
 0xa2b   : > { %p1789_p6 = pnand %p1788_p1, %p1782_p4 }
 0xa2d   : > { %1792 = shalt.err (!%p1789_p6)
}
 0xa2e   : > { %1555 = dma.vmem_to_hbm [thread:$0]  (%p2360_p7), %s2263_s0, 128, %s2261_s21, %s1233_s26  }
 0xa2f PF: > { %s2365_s29 = sld [smem:[#allocation17_spill]]  ;;  %s2366_s16 = sld [smem:[#allocation15_spill]] }
 0xa30   : > { %s2367_s25 = sld [smem:[#allocation21_spill]] }
 0xa35   : > { %p1582_p9 = scmp.ge.s32.totalorder %s2365_s29, 2  ;;  %s1278_s12 = sand.u32 1, %s2366_s16  }
 0xa36   : > { %p2368_p2 = scmp.ne.s32.totalorder %s2367_s25, 0  ;;  %s1279_s14 = scalar_lea.sflag [#allocation4], %s1278_s12 }
 0xa38   : > { %p1570_p0 = pnand %p1582_p9, %p2368_p2 }
 0xa3a   : > { %1818 = dma.done.wait (!%p1570_p0), %s1279_s14, 128  }
 0xa3b   : > { %1820 = vsyncadd (!%p1570_p0), %s1279_s14, 4294967168  ;;  %s1288_s22 = scalar_lea.sflag [#allocation10], %s1278_s12 }
 0xa3c   : > { %1822 = dma.done.wait (!%p1570_p0), %s1288_s22, 256  }
 0xa3d   : > { %1824 = vsyncadd (!%p1570_p0), %s1288_s22, 4294967040  ;;  %s2369_s21 = sld [smem:[#allocation18_spill]]  ;;  %s2370_s24 = sld [smem:[#allocation16_spill]] }
 0xa3e   : > { %s2371_s20 = sld [smem:[#allocation19_spill]]  ;;  %s2372_s18 = smov %s1831_s19 }
 0xa43   : > { %p31_p7 = scmp.ge.s32.totalorder %s2369_s21, 4   ;;  %s2373_s19 = smov %s2370_s24 }
 0xa45   :  { %33 = sbr.rel (!%p31_p7) target bundleno = 13 (0xd), region = 142 }
 0xa4c   :  { %1293 = vsyncpa [#allocation3], 1 }
 0xa4d   :  { %1295 = vsyncpa [#allocation3 + $0x1], 1 }
 0xa4e   :  { %1296 = vsyncpa [#allocation6], 1 }
 0xa4f   :  { %1297 = vsyncpa [#allocation4], 1 }
 0xa50   :  { %1299 = vsyncpa [#allocation4 + $0x1], 1 }
 0xa51   :  { %1300 = vsyncpa [#allocation10], 1 }
 0xa52   :  { %1302 = vsyncpa [#allocation10 + $0x1], 1 }

</bundles_post_ra>
